<compile_context>
chip_gen: v6e
topology: v6e:2x2x1
jax: 0.10.0
libtpu: 0.0.40
codegen_flags: <defaults>
</compile_context>

<pallas_src>
import jax
import jax.numpy as jnp
from jax import lax
from jax.experimental import pallas as pl
from jax.experimental.pallas import tpu as pltpu

_LANE = 128


def _round_up(x, m):
    return ((x + m - 1) // m) * m


def _pad2(a, rows, cols):
    return jnp.pad(a, ((0, rows - a.shape[0]), (0, cols - a.shape[1])))


def _vmem_budget_bytes():
    """~60% of the physical VMEM of whatever generation we are running on."""
    try:
        info = pltpu.get_tpu_info()
        cap = int(getattr(info, "vmem_capacity_bytes", 64 << 20))
    except Exception:
        cap = 64 << 20                       # conservative (v7x-sized) fallback
    return max(int(cap * 0.6), 24 << 20)


def _pick_tile_n(n_nodes, m_pad, f_max, budget_bytes):
    """Node tile size.

    Small graphs -> a single full tile (keeps the hT lane dim == full array dim).
    Large graphs -> a multiple of 128 sized against the generation-aware VMEM
    budget; capped at 512 when the budget looks like v7x (64 MiB physical).
    """
    n8 = _round_up(n_nodes, 8)
    if n8 <= 512:
        return n8
    max_tile = 2048 if budget_bytes >= (60 << 20) else 512
    for tn in (2048, 1024, 512, 256, 128):
        if tn > max_tile:
            continue
        # double-buffered per-step blocks: H tile (bf16) + node-feature tiles
        step = tn * m_pad * 2 + tn * f_max * 6
        # resident: E_prev (bf16) + f32 accumulator + E_out (bf16) + W + headroom
        resident = m_pad * f_max * 8 + f_max * f_max * 4 + (4 << 20)
        if 2 * step + resident <= budget_bytes:
            return tn
    return 128


def _compiler_params(semantics, vmem_bytes):
    return pltpu.CompilerParams(dimension_semantics=semantics,
                                vmem_limit_bytes=int(vmem_bytes))


# ---------------------------------------------------------------------------
# Layer-0 edge aggregation:  E_0 = B^-1 * (H^T @ (X @ W_0))
# Streams the pre-transposed incidence hT so both contractions are canonical.
# ---------------------------------------------------------------------------
def _edge_agg_first_kernel(hT_ref, x_ref, w_ref, binv_ref, e_ref, acc_ref):
    i = pl.program_id(0)

    @pl.when(i == 0)
    def _():
        acc_ref[...] = jnp.zeros_like(acc_ref)

    # bf16 x bf16 MXU matmuls, f32 accumulation.
    xw = jnp.dot(x_ref[...], w_ref[...], preferred_element_type=jnp.float32)   # [tn, Fo]
    acc_ref[...] += jnp.dot(hT_ref[...], xw.astype(jnp.bfloat16),
                            preferred_element_type=jnp.float32)                # [M, Fo]

    @pl.when(i == pl.num_programs(0) - 1)
    def _():
        e_ref[...] = (acc_ref[...] * binv_ref[...]).astype(e_ref.dtype)


def _edge_aggregate_first(hT_p, x_p, w_p, binv_p, *, tile_n, vmem):
    m_pad, n_pad = hT_p.shape
    fin_p = x_p.shape[1]
    fout_p = w_p.shape[1]
    n_tiles = n_pad // tile_n

    flops = 2 * n_pad * fin_p * fout_p + 2 * n_pad * m_pad * fout_p
    bytes_acc = (hT_p.size * 2 + x_p.size * 2 + w_p.size * 2 +
                 binv_p.size * 4 + m_pad * fout_p * 2)

    return pl.pallas_call(
        _edge_agg_first_kernel,
        out_shape=jax.ShapeDtypeStruct((m_pad, fout_p), jnp.bfloat16),
        grid_spec=pltpu.PrefetchScalarGridSpec(
            num_scalar_prefetch=0,
            grid=(n_tiles,),
            in_specs=[
                pl.BlockSpec((m_pad, tile_n), lambda i: (0, i)),
                pl.BlockSpec((tile_n, fin_p), lambda i: (i, 0)),
                pl.BlockSpec((fin_p, fout_p), lambda i: (0, 0)),
                pl.BlockSpec((m_pad, 1), lambda i: (0, 0)),
            ],
            out_specs=pl.BlockSpec((m_pad, fout_p), lambda i: (0, 0)),
            scratch_shapes=[pltpu.VMEM((m_pad, fout_p), jnp.float32)],
        ),
        compiler_params=_compiler_params(("arbitrary",), vmem),
        cost_estimate=pl.CostEstimate(flops=int(flops), transcendentals=0,
                                      bytes_accessed=int(bytes_acc)),
    )(hT_p, x_p, w_p, binv_p)


# ---------------------------------------------------------------------------
# Fused layer step (intermediate layers):
#   per node tile:  out = relu(D^-1 * (H_i @ E_prev) + b_prev)
#                   E_next_acc += H_i^T @ (out @ W_next)
# Loads each H tile exactly once per layer boundary (cuts H HBM traffic ~2x).
# ---------------------------------------------------------------------------
def _fused_layer_kernel(h_ref, dinv_ref, e_prev_ref, b_prev_ref, w_ref, binv_ref,
                        e_ref, acc_ref):
    i = pl.program_id(0)

    @pl.when(i == 0)
    def _():
        acc_ref[...] = jnp.zeros_like(acc_ref)

    h = h_ref[...]                                                              # [tn, M] bf16
    # previous layer's hyperedge->node epilogue (scale + bias + ReLU)
    out = jnp.dot(h, e_prev_ref[...], preferred_element_type=jnp.float32)       # [tn, Fp]
    out = jnp.maximum(out * dinv_ref[...] + b_prev_ref[...], 0.0)
    # next layer's X @ W
    xw = jnp.dot(out.astype(jnp.bfloat16), w_ref[...],
                 preferred_element_type=jnp.float32)                            # [tn, Fo]
    # H^T @ XW without materializing the transpose: contract dim 0 of both operands.
    acc_ref[...] += lax.dot_general(
        h, xw.astype(jnp.bfloat16),
        dimension_numbers=(((0,), (0,)), ((), ())),
        preferred_element_type=jnp.float32)                                     # [M, Fo]

    @pl.when(i == pl.num_programs(0) - 1)
    def _():
        e_ref[...] = (acc_ref[...] * binv_ref[...]).astype(e_ref.dtype)


def _fused_layer(h_p, dinv_p, e_prev, b_prev, w_p, binv_p, *, tile_n, vmem):
    n_pad, m_pad = h_p.shape
    fprev_p = e_prev.shape[1]
    fout_p = w_p.shape[1]
    n_tiles = n_pad // tile_n

    flops = (2 * n_pad * m_pad * fprev_p + 2 * n_pad * fprev_p * fout_p +
             2 * n_pad * m_pad * fout_p)
    bytes_acc = (h_p.size * 2 + dinv_p.size * 4 + e_prev.size * 2 + b_prev.size * 4 +
                 w_p.size * 2 + binv_p.size * 4 + m_pad * fout_p * 2)

    return pl.pallas_call(
        _fused_layer_kernel,
        out_shape=jax.ShapeDtypeStruct((m_pad, fout_p), jnp.bfloat16),
        grid_spec=pltpu.PrefetchScalarGridSpec(
            num_scalar_prefetch=0,
            grid=(n_tiles,),
            in_specs=[
                pl.BlockSpec((tile_n, m_pad), lambda i: (i, 0)),
                pl.BlockSpec((tile_n, 1), lambda i: (i, 0)),
                pl.BlockSpec((m_pad, fprev_p), lambda i: (0, 0)),
                pl.BlockSpec((1, fprev_p), lambda i: (0, 0)),
                pl.BlockSpec((fprev_p, fout_p), lambda i: (0, 0)),
                pl.BlockSpec((m_pad, 1), lambda i: (0, 0)),
            ],
            out_specs=pl.BlockSpec((m_pad, fout_p), lambda i: (0, 0)),
            scratch_shapes=[pltpu.VMEM((m_pad, fout_p), jnp.float32)],
        ),
        compiler_params=_compiler_params(("arbitrary",), vmem),
        cost_estimate=pl.CostEstimate(flops=int(flops), transcendentals=0,
                                      bytes_accessed=int(bytes_acc)),
    )(h_p, dinv_p, e_prev, b_prev, w_p, binv_p)


# ---------------------------------------------------------------------------
# Final hyperedge -> node aggregation:  out = D^-1 * (H @ E) + bias   (no ReLU)
# Fully parallel over node tiles (megacore-sharded on v7x).
# ---------------------------------------------------------------------------
def _node_agg_kernel(h_ref, dinv_ref, e_ref, b_ref, o_ref):
    out = jnp.dot(h_ref[...], e_ref[...], preferred_element_type=jnp.float32)
    o_ref[...] = (out * dinv_ref[...] + b_ref[...]).astype(o_ref.dtype)


def _node_aggregate(h_p, dinv_p, e, b_p, *, tile_n, vmem):
    n_pad, m_pad = h_p.shape
    fout_p = e.shape[1]
    n_tiles = n_pad // tile_n

    flops = 2 * n_pad * m_pad * fout_p
    bytes_acc = (h_p.size * 2 + dinv_p.size * 4 + e.size * 2 +
                 b_p.size * 4 + n_pad * fout_p * 4)

    return pl.pallas_call(
        _node_agg_kernel,
        out_shape=jax.ShapeDtypeStruct((n_pad, fout_p), jnp.float32),
        grid_spec=pltpu.PrefetchScalarGridSpec(
            num_scalar_prefetch=0,
            grid=(n_tiles,),
            in_specs=[
                pl.BlockSpec((tile_n, m_pad), lambda i: (i, 0)),
                pl.BlockSpec((tile_n, 1), lambda i: (i, 0)),
                pl.BlockSpec((m_pad, fout_p), lambda i: (0, 0)),
                pl.BlockSpec((1, fout_p), lambda i: (0, 0)),
            ],
            out_specs=pl.BlockSpec((tile_n, fout_p), lambda i: (i, 0)),
        ),
        compiler_params=_compiler_params(("parallel",), vmem),
        cost_estimate=pl.CostEstimate(flops=int(flops), transcendentals=0,
                                      bytes_accessed=int(bytes_acc)),
    )(h_p, dinv_p, e, b_p)


# ---------------------------------------------------------------------------
# Model wrapper
# ---------------------------------------------------------------------------
def init_hypergcn_params(key, input_dim, output_dim, hidden_dim, num_layers):
    """Glorot-style init matching the layer dims of HyperGCN.__init__."""
    if num_layers > 1:
        dims = [(input_dim, hidden_dim)]
        dims += [(hidden_dim, hidden_dim)] * (num_layers - 2)
        dims += [(hidden_dim, output_dim)]
    else:
        dims = [(input_dim, output_dim)]
    params = []
    for (fin, fout) in dims:
        key, kw = jax.random.split(key)
        scale = jnp.sqrt(6.0 / (fin + fout))
        w = jax.random.uniform(kw, (fin, fout), jnp.float32, -scale, scale)
        b = jnp.zeros((1, fout), jnp.float32)
        params.append((w, b))
    return params


def hypergcn_forward(x, hyperedge_index, num_edges, params):
    """HyperGCN.forward (use_attention=False, dropout p=0)."""
    n_nodes, _ = x.shape
    m_edges = num_edges
    out_dim = params[-1][0].shape[1]
    num_layers = len(params)

    node_idx, edge_idx = hyperedge_index[0], hyperedge_index[1]
    # Dense incidence with duplicate counting (matches PyG scatter-add semantics).
    # NOTE: bf16 H assumes incidence multiplicities <= 256 (exact in bf16).
    h_dense = jnp.zeros((n_nodes, m_edges), jnp.float32).at[node_idx, edge_idx].add(1.0)

    # Degree normalizers: computed once, reused by every layer.
    deg_e = h_dense.sum(axis=0)
    deg_n = h_dense.sum(axis=1)
    b_inv = jnp.where(deg_e > 0, 1.0 / jnp.where(deg_e > 0, deg_e, 1.0), 0.0)
    d_inv = jnp.where(deg_n > 0, 1.0 / jnp.where(deg_n > 0, deg_n, 1.0), 0.0)

    # Lane-pad edge / feature dims, pick the node tile against the VMEM budget.
    m_pad = _round_up(m_edges, _LANE)
    f_pads = [(_round_up(w.shape[0], _LANE), _round_up(w.shape[1], _LANE)) for w, _ in params]
    max_f = max(max(fp) for fp in f_pads)
    budget = _vmem_budget_bytes()
    tile_n = _pick_tile_n(n_nodes, m_pad, max_f, budget)
    n_pad = _round_up(n_nodes, tile_n)

    h_p = _pad2(h_dense, n_pad, m_pad).astype(jnp.bfloat16)   # 0/1/small counts: exact
    hT_p = h_p.T                                               # one-time; first call only
    binv_p = _pad2(b_inv[:, None], m_pad, 1)
    dinv_p = _pad2(d_inv[:, None], n_pad, 1)
    x_p = _pad2(x, n_pad, f_pads[0][0]).astype(jnp.bfloat16)

    ws = [_pad2(w, fi, fo).astype(jnp.bfloat16) for (w, _), (fi, fo) in zip(params, f_pads)]
    bs = [_pad2(b, 1, fo) for (_, b), (_, fo) in zip(params, f_pads)]

    # Layer 0: node -> hyperedge aggregation.
    e = _edge_aggregate_first(hT_p, x_p, ws[0], binv_p, tile_n=tile_n, vmem=budget)
    # Layers 1..L-1: fuse (layer l-1 node epilogue + ReLU) with (layer l edge aggregation),
    # streaming each H tile once per layer boundary.  Dropout p=0 -> identity.
    for l in range(1, num_layers):
        e = _fused_layer(h_p, dinv_p, e, bs[l - 1], ws[l], binv_p,
                         tile_n=tile_n, vmem=budget)
    # Final hyperedge -> node aggregation (no ReLU on the last layer).
    out_p = _node_aggregate(h_p, dinv_p, e, bs[-1], tile_n=tile_n, vmem=budget)
    return out_p[:n_nodes, :out_dim]


def _reference_forward(x, hyperedge_index, num_edges, params):
    """Pure-JAX f32 reference (same math, no padding/tiling/bf16)."""
    n_nodes = x.shape[0]
    h_dense = jnp.zeros((n_nodes, num_edges), jnp.float32).at[
        hyperedge_index[0], hyperedge_index[1]].add(1.0)
    deg_e = h_dense.sum(0)
    deg_n = h_dense.sum(1)
    b_inv = jnp.where(deg_e > 0, 1.0 / jnp.where(deg_e > 0, deg_e, 1.0), 0.0)
    d_inv = jnp.where(deg_n > 0, 1.0 / jnp.where(deg_n > 0, deg_n, 1.0), 0.0)
    num_layers = len(params)
    for li, (w, b) in enumerate(params):
        xw = x @ w
        e = (h_dense.T @ xw) * b_inv[:, None]
        x = (h_dense @ e) * d_inv[:, None] + b
        if li != num_layers - 1:
            x = jnp.maximum(x, 0.0)
    return x


if __name__ == "__main__":
    key = jax.random.PRNGKey(0)

    # Small problem: 32 nodes, 16 hyperedges, 4 incidences per hyperedge.
    N, M, NNZ_PER_EDGE = 32, 16, 4
    input_dim, hidden_dim, output_dim, num_layers = 8, 32, 4, 3

    key, kx, ke = jax.random.split(key, 3)
    x = jax.random.normal(kx, (N, input_dim), jnp.float32)

    node_ids = jax.random.randint(ke, (M * NNZ_PER_EDGE,), 0, N, dtype=jnp.int32)
    edge_ids = jnp.repeat(jnp.arange(M, dtype=jnp.int32), NNZ_PER_EDGE)
    hyperedge_index = jnp.stack([node_ids, edge_ids], axis=0)   # [2, 64]

    params = init_hypergcn_params(key, input_dim, output_dim, hidden_dim, num_layers)

    out = hypergcn_forward(x, hyperedge_index, M, params)
    out = jax.block_until_ready(out)

    ref = _reference_forward(x, hyperedge_index, M, params)
    assert out.shape == (N, output_dim)
    # bf16 MXU inputs with f32 accumulation -> small rounding vs. the pure-f32 reference.
    assert jnp.allclose(out, ref, atol=3e-2, rtol=3e-2), "mismatch vs reference"

    print("KERNEL_OK")
</pallas_src>

<mosaic_0001>
module attributes {stable_mosaic.version = 11 : i64} {
  func.func @_edge_agg_first_kernel(%arg0: i32, %arg1: memref<128x32xbf16, #tpu.memory_space<vmem>>, %arg2: memref<32x128xbf16, #tpu.memory_space<vmem>>, %arg3: memref<128x128xbf16, #tpu.memory_space<vmem>>, %arg4: memref<128x1xf32, #tpu.memory_space<vmem>>, %arg5: memref<128x128xbf16, #tpu.memory_space<vmem>>, %arg6: memref<128x128xf32, #tpu.memory_space<vmem>>) attributes {dimension_semantics = [#tpu.dimension_semantics<arbitrary>], iteration_bounds = array<i64: 1>, scalar_prefetch = 0 : i64, scratch_operands = 1 : i64, tpu.core_type = #tpu.core_type<tc>, window_params = [{transform_indices = @transform_0, window_bounds = array<i64: 128, 32>}, {transform_indices = @transform_1, window_bounds = array<i64: 32, 128>}, {pipeline_mode = #tpu.pipeline_mode<synchronous>, transform_indices = @transform_2, window_bounds = array<i64: 128, 128>}, {pipeline_mode = #tpu.pipeline_mode<synchronous>, transform_indices = @transform_3, window_bounds = array<i64: 128, 1>}, {pipeline_mode = #tpu.pipeline_mode<synchronous>, transform_indices = @transform_4, window_bounds = array<i64: 128, 128>}]} {
    %c0_i32 = arith.constant 0 : i32
    %0 = arith.cmpi eq, %arg0, %c0_i32 : i32
    %1 = arith.extui %0 : i1 to i32
    %c0_i32_0 = arith.constant 0 : i32
    %2 = arith.cmpi ne, %1, %c0_i32_0 : i32
    scf.if %2 {
      %cst_13 = arith.constant 0.000000e+00 : f32
      %15 = vector.broadcast %cst_13 : f32 to vector<128x128xf32>
      %c0_14 = arith.constant 0 : index
      %c0_15 = arith.constant 0 : index
      %16 = vector.load %arg6[%c0_14, %c0_15] : memref<128x128xf32, #tpu.memory_space<vmem>>, vector<128x128xf32>
      tpu.vector_store %arg6[%c0_14, %c0_15], %15 {strides = array<i32>} : memref<128x128xf32, #tpu.memory_space<vmem>>, vector<128x128xf32>,
    } else {
    }
    %c0 = arith.constant 0 : index
    %c0_1 = arith.constant 0 : index
    %3 = vector.load %arg2[%c0, %c0_1] : memref<32x128xbf16, #tpu.memory_space<vmem>>, vector<32x128xbf16>
    %c0_2 = arith.constant 0 : index
    %c0_3 = arith.constant 0 : index
    %4 = vector.load %arg3[%c0_2, %c0_3] : memref<128x128xbf16, #tpu.memory_space<vmem>>, vector<128x128xbf16>
    %cst = arith.constant dense<0.000000e+00> : vector<32x128xf32>
    %5 = tpu.matmul %3, %4, %cst {dimension_numbers = #tpu.dot_dimension_numbers<[1], [0], [0], [1], [0, 0, 1, 1], [], []>} : vector<32x128xbf16>, vector<128x128xbf16>, vector<32x128xf32> -> vector<32x128xf32>
    %c0_4 = arith.constant 0 : index
    %c0_5 = arith.constant 0 : index
    %6 = vector.load %arg6[%c0_4, %c0_5] : memref<128x128xf32, #tpu.memory_space<vmem>>, vector<128x128xf32>
    %c0_6 = arith.constant 0 : index
    %c0_7 = arith.constant 0 : index
    %7 = vector.load %arg1[%c0_6, %c0_7] : memref<128x32xbf16, #tpu.memory_space<vmem>>, vector<128x32xbf16>
    %8 = arith.truncf %5 : vector<32x128xf32> to vector<32x128xbf16>
    %cst_8 = arith.constant dense<0.000000e+00> : vector<128x128xf32>
    %9 = tpu.matmul %7, %8, %cst_8 {dimension_numbers = #tpu.dot_dimension_numbers<[1], [0], [0], [1], [0, 0, 1, 1], [], []>} : vector<128x32xbf16>, vector<32x128xbf16>, vector<128x128xf32> -> vector<128x128xf32>
    %10 = arith.addf %6, %9 : vector<128x128xf32>
    %c0_9 = arith.constant 0 : index
    %c0_10 = arith.constant 0 : index
    %11 = vector.load %arg6[%c0_9, %c0_10] : memref<128x128xf32, #tpu.memory_space<vmem>>, vector<128x128xf32>
    tpu.vector_store %arg6[%c0_9, %c0_10], %10 {strides = array<i32>} : memref<128x128xf32, #tpu.memory_space<vmem>>, vector<128x128xf32>,
    %c0_i32_11 = arith.constant 0 : i32
    %12 = arith.cmpi eq, %arg0, %c0_i32_11 : i32
    %13 = arith.extui %12 : i1 to i32
    %c0_i32_12 = arith.constant 0 : i32
    %14 = arith.cmpi ne, %13, %c0_i32_12 : i32
    scf.if %14 {
      %c0_13 = arith.constant 0 : index
      %c0_14 = arith.constant 0 : index
      %15 = vector.load %arg6[%c0_13, %c0_14] : memref<128x128xf32, #tpu.memory_space<vmem>>, vector<128x128xf32>
      %c0_15 = arith.constant 0 : index
      %c0_16 = arith.constant 0 : index
      %16 = vector.load %arg4[%c0_15, %c0_16] : memref<128x1xf32, #tpu.memory_space<vmem>>, vector<128x1xf32>
      %17 = vector.broadcast %16 : vector<128x1xf32> to vector<128x128xf32>
      %18 = arith.mulf %15, %17 : vector<128x128xf32>
      %19 = arith.truncf %18 : vector<128x128xf32> to vector<128x128xbf16>
      %c0_17 = arith.constant 0 : index
      %c0_18 = arith.constant 0 : index
      %20 = vector.load %arg5[%c0_17, %c0_18] : memref<128x128xbf16, #tpu.memory_space<vmem>>, vector<128x128xbf16>
      tpu.vector_store %arg5[%c0_17, %c0_18], %19 {strides = array<i32>} : memref<128x128xbf16, #tpu.memory_space<vmem>>, vector<128x128xbf16>,
    } else {
    }
    return
  }
  func.func @transform_0(%arg0: i32) -> (i32, i32) {
    %c0_i32 = arith.constant 0 : i32
    %c0_i32_0 = arith.constant 0 : i32
    return %c0_i32, %arg0 : i32, i32
  }
  func.func @transform_1(%arg0: i32) -> (i32, i32) {
    %c0_i32 = arith.constant 0 : i32
    %c0_i32_0 = arith.constant 0 : i32
    return %arg0, %c0_i32 : i32, i32
  }
  func.func @transform_2(%arg0: i32) -> (i32, i32) {
    %c0_i32 = arith.constant 0 : i32
    %c0_i32_0 = arith.constant 0 : i32
    %c0_i32_1 = arith.constant 0 : i32
    return %c0_i32, %c0_i32_0 : i32, i32
  }
  func.func @transform_3(%arg0: i32) -> (i32, i32) {
    %c0_i32 = arith.constant 0 : i32
    %c0_i32_0 = arith.constant 0 : i32
    %c0_i32_1 = arith.constant 0 : i32
    return %c0_i32, %c0_i32_0 : i32, i32
  }
  func.func @transform_4(%arg0: i32) -> (i32, i32) {
    %c0_i32 = arith.constant 0 : i32
    %c0_i32_0 = arith.constant 0 : i32
    %c0_i32_1 = arith.constant 0 : i32
    return %c0_i32, %c0_i32_0 : i32, i32
  }
}

</mosaic_0001>

<bundles_post_ra>
// kernel: tpu_custom_call.1
= control target key start
LH: loop header
LB: loop body
LE: loop exit
PB: predicated region body
PF: predicated region fallthrough
CT: control target
= control target key end

     0   :  { %s976_s0 = inlined_call_operand.vmem [shape: bf16[128,32], index: 0, kind: input, shape index: {}]   ;;  %s977_s1 = inlined_call_operand.vmem [shape: bf16[32,128], index: 1, kind: input, shape index: {}]   ;;  %s978_s2 = inlined_call_operand.vmem [shape: bf16[128,128], index: 2, kind: input, shape index: {}]   ;;  %s979_s3 = inlined_call_operand.vmem [shape: f32[128,1], index: 3, kind: input, shape index: {}]   ;;  %s980_s4 = inlined_call_operand.hbm [shape: bf16[128,128], index: 4, kind: output, shape index: {}]  }
   0x1   :  { %v794_v0 = vld [vmem:[%s978_s2 + $0x38] sm:$0xff]   ;;  %v795_v1 = vld [vmem:[%s978_s2 + $0x30] sm:$0xff]   ;;  %v796_v2 = vld [vmem:[%s978_s2 + $0x28] sm:$0xff]  }
   0x2   :  { %748 = vmatprep.subr.bf16.mxu0 %v794_v0  ;;  %v797_v3 = vld [vmem:[%s978_s2 + $0x20] sm:$0xff]   ;;  %v798_v5 = vld [vmem:[%s978_s2 + $0x18] sm:$0xff]  }
   0x3   :  { %749 = vmatpush3.bf16.msra.mxu0 %v794_v0  ;;  %v802_v4 = vld [vmem:[%s977_s1] sm:$0xff]  }
   0x4   :  { %750 = vmatprep.subr.bf16.mxu0 %v795_v1  ;;  %764 = vmatprep.mubr.bf16.mxu0 %v802_v4 }
   0x7   :  { %751 = vmatpush3.bf16.msra.mxu0 %v795_v1 }
   0x8   :  { %752 = vmatprep.subr.bf16.mxu0 %v796_v2 }
   0xb   :  { %753 = vmatpush3.bf16.msra.mxu0 %v796_v2 }
   0xc   :  { %754 = vmatprep.subr.bf16.mxu0 %v797_v3 }
   0xf   :  { %755 = vmatpush3.bf16.msra.mxu0 %v797_v3 }
  0x10   :  { %9 = vsyncpa [#allocation4], 0  ;;  %756 = vmatprep.subr.bf16.mxu0 %v798_v5  ;;  %v799_v6 = vld [vmem:[%s978_s2 + $0x10] sm:$0xff]   ;;  %v800_v7 = vld [vmem:[%s978_s2 + $0x8] sm:$0xff]   ;;  %vm242_vm0 = vcmask 261120   ;;  %v834_v13 = vmov 0  }
  0x11   :  { %v801_v8 = vld [vmem:[%s978_s2] sm:$0xff]   ;;  %v803_v9 = vld [vmem:[%s977_s1 + $0x8] sm:$0xff]   ;;  %v417_v11 = vld [vmem:[%s979_s3 + $0x10] sm:$0xff]  ;;  %793 = vset.pattern.permute.xlu1 %v834_v13  ;;  %792 = vset.pattern.permute.xlu0 %v834_v13 }
  0x12   :  { %v804_v10 = vld [vmem:[%s976_s0] sm:$0xff]   ;;  %443 = vperm.xlu1 %793, %v417_v11   ;;  %v418_v14 = vld [vmem:[%s979_s3 + $0x18] sm:$0xff]  ;;  %v416_v15 = vld [vmem:[%s979_s3 + $0x8] sm:$0xff] }
  0x13   :  { %757 = vmatpush3.bf16.msra.mxu0 %v798_v5  ;;  %772 = vmatprep.mubr.msk.bf16.mxu1 %vm242_vm0, %v804_v10  ;;  %v415_v12 = vld [vmem:[%s979_s3] sm:$0xff]  ;;  %v420_v16 = vld [vmem:[%s979_s3 + $0x28] sm:$0xff]  ;;  %v422_v18 = vld [vmem:[%s979_s3 + $0x38] sm:$0xff] }
  0x14   :  { %758 = vmatprep.subr.bf16.mxu0 %v799_v6  ;;  %433 = vperm.xlu0 %792, %v415_v12   ;;  %v419_v17 = vld [vmem:[%s979_s3 + $0x20] sm:$0xff]  ;;  %v421_v19 = vld [vmem:[%s979_s3 + $0x30] sm:$0xff]  ;;  %v424_v20 = vld [vmem:[%s979_s3 + $0x48] sm:$0xff] }
  0x15   :  { %v423_v21 = vld [vmem:[%s979_s3 + $0x40] sm:$0xff]  ;;  %v426_v22 = vld [vmem:[%s979_s3 + $0x58] sm:$0xff]  ;;  %v425_v23 = vld [vmem:[%s979_s3 + $0x50] sm:$0xff] }
  0x16   :  { %448 = vperm.xlu1 %793, %v418_v14   ;;  %v428_v24 = vld [vmem:[%s979_s3 + $0x68] sm:$0xff]  ;;  %v427_v25 = vld [vmem:[%s979_s3 + $0x60] sm:$0xff]  ;;  %v430_v26 = vld [vmem:[%s979_s3 + $0x78] sm:$0xff] }
  0x17   :  { %759 = vmatpush3.bf16.msra.mxu0 %v799_v6  ;;  %v429_v27 = vld [vmem:[%s979_s3 + $0x70] sm:$0xff]  ;;  %v805_v34 = vld [vmem:[%s976_s0 + $0x8] sm:$0xff]   ;;  %v807_v36 = vld [vmem:[%s976_s0 + $0x18] sm:$0xff]  }
  0x18   :  { %760 = vmatprep.subr.bf16.mxu0 %v800_v7  ;;  %438 = vperm.xlu0 %792, %v416_v15   ;;  %v806_v35 = vld [vmem:[%s976_s0 + $0x10] sm:$0xff]   ;;  %v808_v37 = vld [vmem:[%s976_s0 + $0x20] sm:$0xff]   ;;  %v809_v38 = vld [vmem:[%s976_s0 + $0x28] sm:$0xff]  }
  0x19   :  { %v810_v39 = vld [vmem:[%s976_s0 + $0x30] sm:$0xff]   ;;  %v811_v40 = vld [vmem:[%s976_s0 + $0x38] sm:$0xff]   ;;  %s835_s0 = smov [#allocation3]  }
  0x1a   :  { %458 = vperm.xlu1 %793, %v420_v16   ;;  %s612_s26 = sshll.u32 %s835_s0, 4  ;;  %s613_s26 = int_to_ptr.vmem [resolvable:$true] %s612_s26 }
  0x1b   :  { %761 = vmatpush3.bf16.msra.mxu0 %v800_v7  ;;  %s812_s27 = scalar_lea.vmem %s613_s26, 1024  ;;  %p817_p1 = scmp.lt.s32.totalorder %s613_s26, %s613_s26 }
  0x1c   :  { %762 = vmatprep.subr.bf16.mxu0 %v801_v8  ;;  %453 = vperm.xlu0 %792, %v419_v17   ;;  %p813_p0 = scmp.ne.s32.totalorder %s613_s26, %s812_s27  ;;  %p818_p2 = scmp.lt.s32.totalorder %s812_s27, %s812_s27 }
  0x1e   :  { %468 = vperm.xlu1 %793, %v422_v18   ;;  %p819_p3 = por %p818_p2, %p817_p1 }
  0x1f   :  { %763 = vmatpush3.bf16.msra.mxu0 %v801_v8 }
  0x20   :  { %463 = vperm.xlu0 %792, %v421_v19   ;;  %p820_p4 = pnand %p819_p3, %p813_p0 }
  0x22   :  { %765 = vmatmul.mubr.bf16.vlgmr.msra.gmra.mxu0 %v803_v9  ;;  %478 = vperm.xlu1 %793, %v424_v20  }
  0x24   :  { %473 = vperm.xlu0 %792, %v423_v21  }
  0x26   :  { %488 = vperm.xlu1 %793, %v426_v22  }
  0x28   :  { %483 = vperm.xlu0 %792, %v425_v23  }
  0x2a   :  { %498 = vperm.xlu1 %793, %v428_v24  }
  0x2c   :  { %493 = vperm.xlu0 %792, %v427_v25  }
  0x2e   :  { %508 = vperm.xlu1 %793, %v430_v26  }
  0x30   :  { %503 = vperm.xlu0 %792, %v429_v27  }
  0x8d   :  { %v444_v41 = vpop.permute.xlu1 %443 }
  0x8f   :  { %v434_v42 = vpop.permute.xlu0 %433 }
  0x91   :  { %v449_v43 = vpop.permute.xlu1 %448 }
  0x93   :  { %v439_v44 = vpop.permute.xlu0 %438 }
  0x95   :  { %v459_v45 = vpop.permute.xlu1 %458 }
  0x97   :  { %v454_v46 = vpop.permute.xlu0 %453 }
  0x99   :  { %v469_v49 = vpop.permute.xlu1 %468 }
  0x9b   :  { %v464_v50 = vpop.permute.xlu0 %463 }
  0x9d   :  { %v479_v59 = vpop.permute.xlu1 %478 }
  0x9f   :  { %v474_v61 = vpop.permute.xlu0 %473 }
  0xa1   :  { %v489_v3 = vpop.permute.xlu1 %488 }
  0xa3   :  { %v484_v7 = vpop.permute.xlu0 %483 }
  0xa5   :  { %v499_v12 = vpop.permute.xlu1 %498 }
  0xa7   :  { %v494_v15 = vpop.permute.xlu0 %493 }
  0xa9   :  { %v509_v23 = vpop.permute.xlu1 %508 }
  0xab   :  { %v504_v24 = vpop.permute.xlu0 %503 }
  0xe2   :  { %v766_v28 = vpop.f32.mrf.mxu0 }
  0xe4   :  { %v153_v29 = vpop.f32.mrf.mxu0 }
  0xe6   :  { %v767_v30 = vpop.f32.mrf.mxu0 }
  0xe7   :  { %v201_v31 = vpack.c.bf16 %v767_v30, %v766_v28 }
  0xe8   :  { %v156_v32 = vpop.f32.mrf.mxu0 }
  0xe9   :  { %v200_v33 = vpack.c.bf16 %v156_v32, %v153_v29  ;;  %768 = vmatprep.subr.bf16.mxu1 %v201_v31 }
  0xea   :  { %769 = vmatpush3.bf16.msra.mxu1 %v201_v31 }
  0xeb   :  { %770 = vmatprep.subr.bf16.mxu1 %v200_v33 }
  0xee   :  { %771 = vmatpush3.bf16.msra.mxu1 %v200_v33 }
  0xf1   :  { %773 = vmatmul.mubr.msk.bf16.vlgmr.msra.gmra.mxu1 %vm242_vm0, %v805_v34 }
  0xf2   :  { %776 = vmatprep.mubr.msk.bf16.mxu1 %vm242_vm0, %v806_v35 }
  0xf9   :  { %777 = vmatmul.mubr.msk.bf16.gmra.mxu1 %vm242_vm0, %v807_v36 }
  0xfa   :  { %780 = vmatprep.mubr.msk.bf16.mxu1 %vm242_vm0, %v808_v37 }
 0x101   :  { %781 = vmatmul.mubr.msk.bf16.gmra.mxu1 %vm242_vm0, %v809_v38 }
 0x102   :  { %784 = vmatprep.mubr.msk.bf16.mxu1 %vm242_vm0, %v810_v39 }
 0x109   :  { %785 = vmatmul.mubr.msk.bf16.gmra.mxu1 %vm242_vm0, %v811_v40 }
 0x1b1   :  { %v774_v47 = vpop.f32.mrf.mxu1 }
 0x1b2   :  { %v513_v52 = vmul.f32 %v774_v47, %v444_v41 }
 0x1b3   :  { %v301_v48 = vpop.f32.mrf.mxu1 }
 0x1b4   :  { %v511_v55 = vmul.f32 %v434_v42, %v301_v48 }
 0x1b5   :  { %v775_v51 = vpop.f32.mrf.mxu1 }
 0x1b6   :  { %v514_v53 = vmul.f32 %v775_v51, %v449_v43 }
 0x1b7   :  { %v304_v54 = vpop.f32.mrf.mxu1 }
 0x1b8   :  { %v689_v56 = vpack.c.bf16 %v514_v53, %v513_v52  ;;  %v512_v57 = vmul.f32 %v439_v44, %v304_v54 }
 0x1b9   :  { %v778_v58 = vpop.f32.mrf.mxu1 }
 0x1ba   :  { %721 = vst [vmem:[#allocation3 + $0x8] sm:$0xff] %v689_v56   ;;  %v684_v60 = vpack.c.bf16 %v512_v57, %v511_v55  ;;  %v517_v0 = vmul.f32 %v778_v58, %v464_v50 }
 0x1bb   :  { %v317_v62 = vpop.f32.mrf.mxu1 }
 0x1bc   :  { %685 = vst [vmem:[#allocation3] sm:$0xff] %v684_v60   ;;  %v515_v4 = vmul.f32 %v454_v46, %v317_v62 }
 0x1bd   :  { %v779_v63 = vpop.f32.mrf.mxu1 }
 0x1be   :  { %v518_v1 = vmul.f32 %v779_v63, %v469_v49 }
 0x1bf   :  { %v320_v2 = vpop.f32.mrf.mxu1 }
 0x1c0   :  { %v699_v5 = vpack.c.bf16 %v518_v1, %v517_v0  ;;  %v516_v6 = vmul.f32 %v459_v45, %v320_v2 }
 0x1c1   :  { %v782_v8 = vpop.f32.mrf.mxu1 }
 0x1c2   :  { %723 = vst [vmem:[#allocation3 + $0x18] sm:$0xff] %v699_v5   ;;  %v694_v9 = vpack.c.bf16 %v516_v6, %v515_v4  ;;  %v521_v13 = vmul.f32 %v782_v8, %v484_v7 }
 0x1c3   :  { %v333_v10 = vpop.f32.mrf.mxu1 }
 0x1c4   :  { %722 = vst [vmem:[#allocation3 + $0x10] sm:$0xff] %v694_v9   ;;  %v519_v17 = vmul.f32 %v474_v61, %v333_v10 }
 0x1c5   :  { %v783_v11 = vpop.f32.mrf.mxu1 }
 0x1c6   :  { %v522_v14 = vmul.f32 %v783_v11, %v489_v3 }
 0x1c7   :  { %v336_v16 = vpop.f32.mrf.mxu1 }
 0x1c8   :  { %v709_v18 = vpack.c.bf16 %v522_v14, %v521_v13  ;;  %v520_v19 = vmul.f32 %v479_v59, %v336_v16 }
 0x1c9   :  { %v786_v20 = vpop.f32.mrf.mxu1 }
 0x1ca   :  { %725 = vst [vmem:[#allocation3 + $0x28] sm:$0xff] %v709_v18   ;;  %v704_v21 = vpack.c.bf16 %v520_v19, %v519_v17  ;;  %v525_v26 = vmul.f32 %v786_v20, %v504_v24 }
 0x1cb   :  { %v349_v22 = vpop.f32.mrf.mxu1 }
 0x1cc   :  { %724 = vst [vmem:[#allocation3 + $0x20] sm:$0xff] %v704_v21   ;;  %v523_v29 = vmul.f32 %v494_v15, %v349_v22 }
 0x1cd   :  { %v787_v25 = vpop.f32.mrf.mxu1 }
 0x1ce   :  { %v526_v27 = vmul.f32 %v787_v25, %v509_v23 }
 0x1cf   :  { %v352_v28 = vpop.f32.mrf.mxu1 }
 0x1d0   :  { %v719_v30 = vpack.c.bf16 %v526_v27, %v525_v26  ;;  %v524_v31 = vmul.f32 %v499_v12, %v352_v28 }
 0x1d2   :  { %727 = vst [vmem:[#allocation3 + $0x38] sm:$0xff] %v719_v30   ;;  %v714_v32 = vpack.c.bf16 %v524_v31, %v523_v29 }
 0x1d4   :  { %726 = vst [vmem:[#allocation3 + $0x30] sm:$0xff] %v714_v32  }
 0x1d5   :  { %823 = shalt.err (!%p820_p4)
}
 0x1d6   :  { %s836_s28 = smov 64   ;;  %s837_s29 = smov 4  }
 0x1d7   :  { %618 = dma.vmem_to_hbm [thread:$0]  %s613_s26, 1024, %s980_s4, [#allocation4], %s836_s28, %s836_s28, %s837_s29  }
 0x1d8   :  { %832 = dma.done.wait [#allocation4], 1024  }
 0x1d9   :  { %833 = vsyncadd [#allocation4], 4294966272 }
 0x1da   :  { %622 = vsyncpa [#allocation4], 1 }

</bundles_post_ra>
